<compile_context>
chip_gen: v7x
topology: tpu7x:2x2x1
jax: 0.10.0
libtpu: 0.0.40
codegen_flags: <defaults>
</compile_context>

<pallas_src>
import functools

import jax
import jax.numpy as jnp
from jax import lax
from jax.experimental import pallas as pl
from jax.experimental.pallas import tpu as pltpu

_EPS = 1e-5


def _conv_block_kernel(x_ref, wb1_ref, wb2_ref, shift_ref, proj_ref,
                       g1_ref, bt1_ref, g2_ref, bt2_ref, out_ref, *, inv_n):
    """Fused ConvBlock on a lane-dense (N*H, W*C) slab.

    x_ref:     (N*H, W*Cin)         input rows, lane-dense
    wb1_ref:   (3, W*Cin,  W*Cout)  band weights for conv1 (one per row tap ky)
    wb2_ref:   (3, W*Cout, W*Cout)  band weights for conv2
    shift_ref: (2, N*H, N*H)        row-shift matrices (fetch y-1 / y+1, zero pad)
    proj_ref:  (W*Cout, W*Cout)     1 where two lanes map to the same channel
    g*_ref, bt*_ref: (1, W*Cout)    BN gamma/beta tiled across lanes
    out_ref:   (N*H, W*Cout)
    inv_n:     1 / (N*H*W)          (static python float)
    """
    s_up = shift_ref[0]      # picks row y-1 (zero at the top border)
    s_dn = shift_ref[1]      # picks row y+1 (zero at the bottom border)
    proj = proj_ref[...]

    def stage(x2d, wb_ref, gamma_l, beta_l):
        # 3x3 conv: row taps via shift matmuls; column + channel taps are
        # folded into the band matrices (zero padding included).
        x_up = jnp.dot(s_up, x2d, preferred_element_type=jnp.float32)
        x_dn = jnp.dot(s_dn, x2d, preferred_element_type=jnp.float32)
        acc = jnp.dot(x_up, wb_ref[0], preferred_element_type=jnp.float32)
        acc = acc + jnp.dot(x2d, wb_ref[1], preferred_element_type=jnp.float32)
        acc = acc + jnp.dot(x_dn, wb_ref[2], preferred_element_type=jnp.float32)

        # BatchNorm2d (training-mode batch stats), single pass: E[x], E[x^2]
        # reduced per channel with the same-channel projector, already
        # broadcast back to every lane.
        m1 = jnp.dot(acc, proj, preferred_element_type=jnp.float32)
        m2 = jnp.dot(acc * acc, proj, preferred_element_type=jnp.float32)
        mean_l = jnp.sum(m1, axis=0, keepdims=True) * inv_n       # (1, L)
        msq_l = jnp.sum(m2, axis=0, keepdims=True) * inv_n        # (1, L)
        var_l = msq_l - mean_l * mean_l
        inv_std = lax.rsqrt(var_l + _EPS)
        y = (acc - mean_l) * (inv_std * gamma_l) + beta_l
        return jnp.maximum(y, 0.0)                                # ReLU

    x2d = x_ref[...].astype(jnp.float32)
    h = stage(x2d, wb1_ref, g1_ref[...], bt1_ref[...])            # conv1+bn1+relu
    y = stage(h, wb2_ref, g2_ref[...], bt2_ref[...])              # conv2+bn2+relu
    out_ref[...] = y.astype(out_ref.dtype)


# -----------------------------------------------------------------------------
# Wrapper-side (jit-traced) weight preprocessing — tiny, one-time per shape.
# -----------------------------------------------------------------------------
def _band_weights(w_hwio, W):
    """(3,3,Cin,Cout) HWIO -> (3, W*Cin, W*Cout) band matrices, one per ky."""
    Cin, Cout = int(w_hwio.shape[2]), int(w_hwio.shape[3])
    bands = []
    for ky in range(3):
        b = jnp.zeros((W * Cin, W * Cout), jnp.float32)
        for kx in range(3):
            shift = jnp.eye(W, k=1 - kx, dtype=jnp.float32)
            b = b + jnp.kron(shift, w_hwio[ky, kx].astype(jnp.float32))
        bands.append(b)
    return jnp.stack(bands, axis=0)


def _row_shift_matrices(N, H):
    """(2, N*H, N*H): fetch row y-1 / y+1 within each image, zero at borders."""
    eye_n = jnp.eye(N, dtype=jnp.float32)
    up = jnp.kron(eye_n, jnp.eye(H, k=-1, dtype=jnp.float32))
    dn = jnp.kron(eye_n, jnp.eye(H, k=1, dtype=jnp.float32))
    return jnp.stack([up, dn], axis=0)


def _channel_projector(W, Cout):
    """(W*Cout, W*Cout): 1 where two lanes belong to the same channel."""
    cmap = jnp.tile(jnp.eye(Cout, dtype=jnp.float32), (W, 1))     # (L, Cout)
    return cmap @ cmap.T


def _tile_lanes(v, W):
    return jnp.tile(v.astype(jnp.float32).reshape(1, -1), (1, W))


@jax.jit
def conv_block_forward(x_nchw, w1, g1, b1, w2, g2, b2):
    """ConvBlock.forward.  x_nchw: (N, Cin, H, W); w*: (3,3,Cin,Cout) HWIO."""
    N, Cin, H, W = x_nchw.shape
    Cout = w1.shape[-1]
    NH, L = N * H, W * Cout

    # Layout plumbing only: NCHW -> lane-dense (N*H, W*Cin) rows.
    x2d = (jnp.transpose(x_nchw, (0, 2, 3, 1))
           .reshape(NH, W * Cin).astype(jnp.float32))

    wb1 = _band_weights(w1, W)            # (3, W*Cin, L)
    wb2 = _band_weights(w2, W)            # (3, L, L)
    shifts = _row_shift_matrices(N, H)    # (2, NH, NH)
    proj = _channel_projector(W, Cout)    # (L, L)
    g1_l, b1_l = _tile_lanes(g1, W), _tile_lanes(b1, W)
    g2_l, b2_l = _tile_lanes(g2, W), _tile_lanes(b2, W)

    kernel = functools.partial(_conv_block_kernel,
                               inv_n=1.0 / float(N * H * W))

    out2d = pl.pallas_call(
        kernel,
        out_shape=jax.ShapeDtypeStruct((NH, L), jnp.float32),
        grid=(1,),
        in_specs=[
            pl.BlockSpec((NH, W * Cin), lambda i: (0, 0)),
            pl.BlockSpec((3, W * Cin, L), lambda i: (0, 0, 0)),
            pl.BlockSpec((3, L, L), lambda i: (0, 0, 0)),
            pl.BlockSpec((2, NH, NH), lambda i: (0, 0, 0)),
            pl.BlockSpec((L, L), lambda i: (0, 0)),
            pl.BlockSpec((1, L), lambda i: (0, 0)),
            pl.BlockSpec((1, L), lambda i: (0, 0)),
            pl.BlockSpec((1, L), lambda i: (0, 0)),
            pl.BlockSpec((1, L), lambda i: (0, 0)),
        ],
        out_specs=pl.BlockSpec((NH, L), lambda i: (0, 0)),
        compiler_params=pltpu.CompilerParams(
            dimension_semantics=("arbitrary",)),
    )(x2d, wb1, wb2, shifts, proj, g1_l, b1_l, g2_l, b2_l)

    out = out2d.reshape(N, H, W, Cout)
    return jnp.transpose(out, (0, 3, 1, 2)).astype(x_nchw.dtype)


# -----------------------------------------------------------------------------
# Pure-JAX reference (same semantics) for a correctness check.
# -----------------------------------------------------------------------------
def _ref_stage(x_nhwc, w_hwio, gamma, beta):
    y = lax.conv_general_dilated(
        x_nhwc.astype(jnp.float32), w_hwio.astype(jnp.float32),
        window_strides=(1, 1), padding="SAME",
        dimension_numbers=("NHWC", "HWIO", "NHWC"))
    mean = jnp.mean(y, axis=(0, 1, 2), keepdims=True)
    var = jnp.mean((y - mean) ** 2, axis=(0, 1, 2), keepdims=True)
    y = (y - mean) * lax.rsqrt(var + _EPS) * gamma + beta
    return jnp.maximum(y, 0.0)


def _ref_forward(x_nchw, w1, g1, b1, w2, g2, b2):
    x = jnp.transpose(x_nchw, (0, 2, 3, 1))
    h = _ref_stage(x, w1, g1, b1)
    y = _ref_stage(h, w2, g2, b2)
    return jnp.transpose(y, (0, 3, 1, 2))


if __name__ == "__main__":
    # Small shapes consistent with ConvBlock(in_channels=4, out_channels=8).
    N, Cin, Cout, H, W = 2, 4, 8, 16, 16

    key = jax.random.PRNGKey(0)
    kx, kw1, kw2 = jax.random.split(key, 3)

    x = jax.random.normal(kx, (N, Cin, H, W), dtype=jnp.float32)

    # Deterministic synthetic parameters (PyTorch-like scale for conv weights;
    # BatchNorm gamma=1, beta=0 as in nn.BatchNorm2d.__init__).
    w1 = jax.random.normal(kw1, (3, 3, Cin, Cout), dtype=jnp.float32) * 0.1   # HWIO
    w2 = jax.random.normal(kw2, (3, 3, Cout, Cout), dtype=jnp.float32) * 0.1  # HWIO
    g1 = jnp.ones((Cout,), jnp.float32)
    b1 = jnp.zeros((Cout,), jnp.float32)
    g2 = jnp.ones((Cout,), jnp.float32)
    b2 = jnp.zeros((Cout,), jnp.float32)

    out = conv_block_forward(x, w1, g1, b1, w2, g2, b2)
    out = jax.block_until_ready(out)

    ref = jax.block_until_ready(_ref_forward(x, w1, g1, b1, w2, g2, b2))
    assert out.shape == (N, Cout, H, W), out.shape
    assert jnp.allclose(out, ref, atol=1e-3, rtol=1e-3), (
        float(jnp.max(jnp.abs(out - ref))))

    print("KERNEL_OK")
</pallas_src>

<mosaic_0001>
module attributes {stable_mosaic.version = 11 : i64} {
  func.func @_conv_block_kernel(%arg0: i32, %arg1: memref<32x64xf32, #tpu.memory_space<vmem>>, %arg2: memref<3x64x128xf32, #tpu.memory_space<vmem>>, %arg3: memref<3x128x128xf32, #tpu.memory_space<vmem>>, %arg4: memref<2x32x32xf32, #tpu.memory_space<vmem>>, %arg5: memref<128x128xf32, #tpu.memory_space<vmem>>, %arg6: memref<1x128xf32, #tpu.memory_space<vmem>>, %arg7: memref<1x128xf32, #tpu.memory_space<vmem>>, %arg8: memref<1x128xf32, #tpu.memory_space<vmem>>, %arg9: memref<1x128xf32, #tpu.memory_space<vmem>>, %arg10: memref<32x128xf32, #tpu.memory_space<vmem>>) attributes {dimension_semantics = [#tpu.dimension_semantics<arbitrary>], iteration_bounds = array<i64: 1>, scalar_prefetch = 0 : i64, scratch_operands = 0 : i64, tpu.core_type = #tpu.core_type<tc>, window_params = [{pipeline_mode = #tpu.pipeline_mode<synchronous>, transform_indices = @transform_0, window_bounds = array<i64: 32, 64>}, {pipeline_mode = #tpu.pipeline_mode<synchronous>, transform_indices = @transform_1, window_bounds = array<i64: 3, 64, 128>}, {pipeline_mode = #tpu.pipeline_mode<synchronous>, transform_indices = @transform_2, window_bounds = array<i64: 3, 128, 128>}, {pipeline_mode = #tpu.pipeline_mode<synchronous>, transform_indices = @transform_3, window_bounds = array<i64: 2, 32, 32>}, {pipeline_mode = #tpu.pipeline_mode<synchronous>, transform_indices = @transform_4, window_bounds = array<i64: 128, 128>}, {pipeline_mode = #tpu.pipeline_mode<synchronous>, transform_indices = @transform_5, window_bounds = array<i64: 1, 128>}, {pipeline_mode = #tpu.pipeline_mode<synchronous>, transform_indices = @transform_6, window_bounds = array<i64: 1, 128>}, {pipeline_mode = #tpu.pipeline_mode<synchronous>, transform_indices = @transform_7, window_bounds = array<i64: 1, 128>}, {pipeline_mode = #tpu.pipeline_mode<synchronous>, transform_indices = @transform_8, window_bounds = array<i64: 1, 128>}, {pipeline_mode = #tpu.pipeline_mode<synchronous>, transform_indices = @transform_9, window_bounds = array<i64: 32, 128>}]} {
    %c0 = arith.constant 0 : index
    %c0_0 = arith.constant 0 : index
    %c0_1 = arith.constant 0 : index
    %0 = vector.load %arg4[%c0, %c0_0, %c0_1] : memref<2x32x32xf32, #tpu.memory_space<vmem>>, vector<1x32x32xf32>
    %1 = vector.shape_cast %0 : vector<1x32x32xf32> to vector<32x32xf32>
    %c1 = arith.constant 1 : index
    %c0_2 = arith.constant 0 : index
    %c0_3 = arith.constant 0 : index
    %2 = vector.load %arg4[%c1, %c0_2, %c0_3] : memref<2x32x32xf32, #tpu.memory_space<vmem>>, vector<1x32x32xf32>
    %3 = vector.shape_cast %2 : vector<1x32x32xf32> to vector<32x32xf32>
    %c0_4 = arith.constant 0 : index
    %c0_5 = arith.constant 0 : index
    %4 = vector.load %arg5[%c0_4, %c0_5] : memref<128x128xf32, #tpu.memory_space<vmem>>, vector<128x128xf32>
    %c0_6 = arith.constant 0 : index
    %c0_7 = arith.constant 0 : index
    %5 = vector.load %arg1[%c0_6, %c0_7] : memref<32x64xf32, #tpu.memory_space<vmem>>, vector<32x64xf32>
    %c0_8 = arith.constant 0 : index
    %c0_9 = arith.constant 0 : index
    %6 = vector.load %arg6[%c0_8, %c0_9] : memref<1x128xf32, #tpu.memory_space<vmem>>, vector<1x128xf32>
    %c0_10 = arith.constant 0 : index
    %c0_11 = arith.constant 0 : index
    %7 = vector.load %arg7[%c0_10, %c0_11] : memref<1x128xf32, #tpu.memory_space<vmem>>, vector<1x128xf32>
    %cst = arith.constant dense<0.000000e+00> : vector<32x64xf32>
    %8 = tpu.matmul %1, %5, %cst {dimension_numbers = #tpu.dot_dimension_numbers<[1], [0], [0], [1], [0, 0, 1, 1], [], []>} : vector<32x32xf32>, vector<32x64xf32>, vector<32x64xf32> -> vector<32x64xf32>
    %cst_12 = arith.constant dense<0.000000e+00> : vector<32x64xf32>
    %9 = tpu.matmul %3, %5, %cst_12 {dimension_numbers = #tpu.dot_dimension_numbers<[1], [0], [0], [1], [0, 0, 1, 1], [], []>} : vector<32x32xf32>, vector<32x64xf32>, vector<32x64xf32> -> vector<32x64xf32>
    %c0_13 = arith.constant 0 : index
    %c0_14 = arith.constant 0 : index
    %c0_15 = arith.constant 0 : index
    %10 = vector.load %arg2[%c0_13, %c0_14, %c0_15] : memref<3x64x128xf32, #tpu.memory_space<vmem>>, vector<1x64x128xf32>
    %11 = vector.shape_cast %10 : vector<1x64x128xf32> to vector<64x128xf32>
    %cst_16 = arith.constant dense<0.000000e+00> : vector<32x128xf32>
    %12 = tpu.matmul %8, %11, %cst_16 {dimension_numbers = #tpu.dot_dimension_numbers<[1], [0], [0], [1], [0, 0, 1, 1], [], []>} : vector<32x64xf32>, vector<64x128xf32>, vector<32x128xf32> -> vector<32x128xf32>
    %c1_17 = arith.constant 1 : index
    %c0_18 = arith.constant 0 : index
    %c0_19 = arith.constant 0 : index
    %13 = vector.load %arg2[%c1_17, %c0_18, %c0_19] : memref<3x64x128xf32, #tpu.memory_space<vmem>>, vector<1x64x128xf32>
    %14 = vector.shape_cast %13 : vector<1x64x128xf32> to vector<64x128xf32>
    %cst_20 = arith.constant dense<0.000000e+00> : vector<32x128xf32>
    %15 = tpu.matmul %5, %14, %cst_20 {dimension_numbers = #tpu.dot_dimension_numbers<[1], [0], [0], [1], [0, 0, 1, 1], [], []>} : vector<32x64xf32>, vector<64x128xf32>, vector<32x128xf32> -> vector<32x128xf32>
    %16 = arith.addf %12, %15 : vector<32x128xf32>
    %c2 = arith.constant 2 : index
    %c0_21 = arith.constant 0 : index
    %c0_22 = arith.constant 0 : index
    %17 = vector.load %arg2[%c2, %c0_21, %c0_22] : memref<3x64x128xf32, #tpu.memory_space<vmem>>, vector<1x64x128xf32>
    %18 = vector.shape_cast %17 : vector<1x64x128xf32> to vector<64x128xf32>
    %cst_23 = arith.constant dense<0.000000e+00> : vector<32x128xf32>
    %19 = tpu.matmul %9, %18, %cst_23 {dimension_numbers = #tpu.dot_dimension_numbers<[1], [0], [0], [1], [0, 0, 1, 1], [], []>} : vector<32x64xf32>, vector<64x128xf32>, vector<32x128xf32> -> vector<32x128xf32>
    %20 = arith.addf %16, %19 : vector<32x128xf32>
    %cst_24 = arith.constant dense<0.000000e+00> : vector<32x128xf32>
    %21 = tpu.matmul %20, %4, %cst_24 {dimension_numbers = #tpu.dot_dimension_numbers<[1], [0], [0], [1], [0, 0, 1, 1], [], []>} : vector<32x128xf32>, vector<128x128xf32>, vector<32x128xf32> -> vector<32x128xf32>
    %22 = arith.mulf %20, %20 : vector<32x128xf32>
    %cst_25 = arith.constant dense<0.000000e+00> : vector<32x128xf32>
    %23 = tpu.matmul %22, %4, %cst_25 {dimension_numbers = #tpu.dot_dimension_numbers<[1], [0], [0], [1], [0, 0, 1, 1], [], []>} : vector<32x128xf32>, vector<128x128xf32>, vector<32x128xf32> -> vector<32x128xf32>
    %cst_26 = arith.constant dense<0.000000e+00> : vector<128xf32>
    %24 = vector.multi_reduction <add>, %21, %cst_26 [0] : vector<32x128xf32> to vector<128xf32>
    %25 = vector.shape_cast %24 : vector<128xf32> to vector<1x128xf32>
    %cst_27 = arith.constant 0.001953125 : f32
    %26 = vector.broadcast %cst_27 : f32 to vector<1x128xf32>
    %27 = arith.mulf %25, %26 : vector<1x128xf32>
    %cst_28 = arith.constant dense<0.000000e+00> : vector<128xf32>
    %28 = vector.multi_reduction <add>, %23, %cst_28 [0] : vector<32x128xf32> to vector<128xf32>
    %29 = vector.shape_cast %28 : vector<128xf32> to vector<1x128xf32>
    %cst_29 = arith.constant 0.001953125 : f32
    %30 = vector.broadcast %cst_29 : f32 to vector<1x128xf32>
    %31 = arith.mulf %29, %30 : vector<1x128xf32>
    %32 = arith.mulf %27, %27 : vector<1x128xf32>
    %33 = arith.subf %31, %32 : vector<1x128xf32>
    %cst_30 = arith.constant 9.99999974E-6 : f32
    %34 = vector.broadcast %cst_30 : f32 to vector<1x128xf32>
    %35 = arith.addf %33, %34 : vector<1x128xf32>
    %36 = math.rsqrt %35 : vector<1x128xf32>
    %37 = vector.broadcast %27 : vector<1x128xf32> to vector<32x128xf32>
    %38 = arith.subf %20, %37 : vector<32x128xf32>
    %39 = arith.mulf %36, %6 : vector<1x128xf32>
    %40 = vector.broadcast %39 : vector<1x128xf32> to vector<32x128xf32>
    %41 = arith.mulf %38, %40 : vector<32x128xf32>
    %42 = vector.broadcast %7 : vector<1x128xf32> to vector<32x128xf32>
    %43 = arith.addf %41, %42 : vector<32x128xf32>
    %cst_31 = arith.constant 0.000000e+00 : f32
    %44 = vector.broadcast %cst_31 : f32 to vector<32x128xf32>
    %45 = arith.maximumf %43, %44 : vector<32x128xf32>
    %c0_32 = arith.constant 0 : index
    %c0_33 = arith.constant 0 : index
    %46 = vector.load %arg8[%c0_32, %c0_33] : memref<1x128xf32, #tpu.memory_space<vmem>>, vector<1x128xf32>
    %c0_34 = arith.constant 0 : index
    %c0_35 = arith.constant 0 : index
    %47 = vector.load %arg9[%c0_34, %c0_35] : memref<1x128xf32, #tpu.memory_space<vmem>>, vector<1x128xf32>
    %cst_36 = arith.constant dense<0.000000e+00> : vector<32x128xf32>
    %48 = tpu.matmul %1, %45, %cst_36 {dimension_numbers = #tpu.dot_dimension_numbers<[1], [0], [0], [1], [0, 0, 1, 1], [], []>} : vector<32x32xf32>, vector<32x128xf32>, vector<32x128xf32> -> vector<32x128xf32>
    %cst_37 = arith.constant dense<0.000000e+00> : vector<32x128xf32>
    %49 = tpu.matmul %3, %45, %cst_37 {dimension_numbers = #tpu.dot_dimension_numbers<[1], [0], [0], [1], [0, 0, 1, 1], [], []>} : vector<32x32xf32>, vector<32x128xf32>, vector<32x128xf32> -> vector<32x128xf32>
    %c0_38 = arith.constant 0 : index
    %c0_39 = arith.constant 0 : index
    %c0_40 = arith.constant 0 : index
    %50 = vector.load %arg3[%c0_38, %c0_39, %c0_40] : memref<3x128x128xf32, #tpu.memory_space<vmem>>, vector<1x128x128xf32>
    %51 = vector.shape_cast %50 : vector<1x128x128xf32> to vector<128x128xf32>
    %cst_41 = arith.constant dense<0.000000e+00> : vector<32x128xf32>
    %52 = tpu.matmul %48, %51, %cst_41 {dimension_numbers = #tpu.dot_dimension_numbers<[1], [0], [0], [1], [0, 0, 1, 1], [], []>} : vector<32x128xf32>, vector<128x128xf32>, vector<32x128xf32> -> vector<32x128xf32>
    %c1_42 = arith.constant 1 : index
    %c0_43 = arith.constant 0 : index
    %c0_44 = arith.constant 0 : index
    %53 = vector.load %arg3[%c1_42, %c0_43, %c0_44] : memref<3x128x128xf32, #tpu.memory_space<vmem>>, vector<1x128x128xf32>
    %54 = vector.shape_cast %53 : vector<1x128x128xf32> to vector<128x128xf32>
    %cst_45 = arith.constant dense<0.000000e+00> : vector<32x128xf32>
    %55 = tpu.matmul %45, %54, %cst_45 {dimension_numbers = #tpu.dot_dimension_numbers<[1], [0], [0], [1], [0, 0, 1, 1], [], []>} : vector<32x128xf32>, vector<128x128xf32>, vector<32x128xf32> -> vector<32x128xf32>
    %56 = arith.addf %52, %55 : vector<32x128xf32>
    %c2_46 = arith.constant 2 : index
    %c0_47 = arith.constant 0 : index
    %c0_48 = arith.constant 0 : index
    %57 = vector.load %arg3[%c2_46, %c0_47, %c0_48] : memref<3x128x128xf32, #tpu.memory_space<vmem>>, vector<1x128x128xf32>
    %58 = vector.shape_cast %57 : vector<1x128x128xf32> to vector<128x128xf32>
    %cst_49 = arith.constant dense<0.000000e+00> : vector<32x128xf32>
    %59 = tpu.matmul %49, %58, %cst_49 {dimension_numbers = #tpu.dot_dimension_numbers<[1], [0], [0], [1], [0, 0, 1, 1], [], []>} : vector<32x128xf32>, vector<128x128xf32>, vector<32x128xf32> -> vector<32x128xf32>
    %60 = arith.addf %56, %59 : vector<32x128xf32>
    %cst_50 = arith.constant dense<0.000000e+00> : vector<32x128xf32>
    %61 = tpu.matmul %60, %4, %cst_50 {dimension_numbers = #tpu.dot_dimension_numbers<[1], [0], [0], [1], [0, 0, 1, 1], [], []>} : vector<32x128xf32>, vector<128x128xf32>, vector<32x128xf32> -> vector<32x128xf32>
    %62 = arith.mulf %60, %60 : vector<32x128xf32>
    %cst_51 = arith.constant dense<0.000000e+00> : vector<32x128xf32>
    %63 = tpu.matmul %62, %4, %cst_51 {dimension_numbers = #tpu.dot_dimension_numbers<[1], [0], [0], [1], [0, 0, 1, 1], [], []>} : vector<32x128xf32>, vector<128x128xf32>, vector<32x128xf32> -> vector<32x128xf32>
    %cst_52 = arith.constant dense<0.000000e+00> : vector<128xf32>
    %64 = vector.multi_reduction <add>, %61, %cst_52 [0] : vector<32x128xf32> to vector<128xf32>
    %65 = vector.shape_cast %64 : vector<128xf32> to vector<1x128xf32>
    %cst_53 = arith.constant 0.001953125 : f32
    %66 = vector.broadcast %cst_53 : f32 to vector<1x128xf32>
    %67 = arith.mulf %65, %66 : vector<1x128xf32>
    %cst_54 = arith.constant dense<0.000000e+00> : vector<128xf32>
    %68 = vector.multi_reduction <add>, %63, %cst_54 [0] : vector<32x128xf32> to vector<128xf32>
    %69 = vector.shape_cast %68 : vector<128xf32> to vector<1x128xf32>
    %cst_55 = arith.constant 0.001953125 : f32
    %70 = vector.broadcast %cst_55 : f32 to vector<1x128xf32>
    %71 = arith.mulf %69, %70 : vector<1x128xf32>
    %72 = arith.mulf %67, %67 : vector<1x128xf32>
    %73 = arith.subf %71, %72 : vector<1x128xf32>
    %cst_56 = arith.constant 9.99999974E-6 : f32
    %74 = vector.broadcast %cst_56 : f32 to vector<1x128xf32>
    %75 = arith.addf %73, %74 : vector<1x128xf32>
    %76 = math.rsqrt %75 : vector<1x128xf32>
    %77 = vector.broadcast %67 : vector<1x128xf32> to vector<32x128xf32>
    %78 = arith.subf %60, %77 : vector<32x128xf32>
    %79 = arith.mulf %76, %46 : vector<1x128xf32>
    %80 = vector.broadcast %79 : vector<1x128xf32> to vector<32x128xf32>
    %81 = arith.mulf %78, %80 : vector<32x128xf32>
    %82 = vector.broadcast %47 : vector<1x128xf32> to vector<32x128xf32>
    %83 = arith.addf %81, %82 : vector<32x128xf32>
    %cst_57 = arith.constant 0.000000e+00 : f32
    %84 = vector.broadcast %cst_57 : f32 to vector<32x128xf32>
    %85 = arith.maximumf %83, %84 : vector<32x128xf32>
    %c0_58 = arith.constant 0 : index
    %c0_59 = arith.constant 0 : index
    %86 = vector.load %arg10[%c0_58, %c0_59] : memref<32x128xf32, #tpu.memory_space<vmem>>, vector<32x128xf32>
    tpu.vector_store %arg10[%c0_58, %c0_59], %85 {strides = array<i32>} : memref<32x128xf32, #tpu.memory_space<vmem>>, vector<32x128xf32>,
    return
  }
  func.func @transform_0(%arg0: i32) -> (i32, i32) {
    %c0_i32 = arith.constant 0 : i32
    %c0_i32_0 = arith.constant 0 : i32
    %c0_i32_1 = arith.constant 0 : i32
    return %c0_i32, %c0_i32_0 : i32, i32
  }
  func.func @transform_1(%arg0: i32) -> (i32, i32, i32) {
    %c0_i32 = arith.constant 0 : i32
    %c0_i32_0 = arith.constant 0 : i32
    %c0_i32_1 = arith.constant 0 : i32
    %c0_i32_2 = arith.constant 0 : i32
    return %c0_i32, %c0_i32_0, %c0_i32_1 : i32, i32, i32
  }
  func.func @transform_2(%arg0: i32) -> (i32, i32, i32) {
    %c0_i32 = arith.constant 0 : i32
    %c0_i32_0 = arith.constant 0 : i32
    %c0_i32_1 = arith.constant 0 : i32
    %c0_i32_2 = arith.constant 0 : i32
    return %c0_i32, %c0_i32_0, %c0_i32_1 : i32, i32, i32
  }
  func.func @transform_3(%arg0: i32) -> (i32, i32, i32) {
    %c0_i32 = arith.constant 0 : i32
    %c0_i32_0 = arith.constant 0 : i32
    %c0_i32_1 = arith.constant 0 : i32
    %c0_i32_2 = arith.constant 0 : i32
    return %c0_i32, %c0_i32_0, %c0_i32_1 : i32, i32, i32
  }
  func.func @transform_4(%arg0: i32) -> (i32, i32) {
    %c0_i32 = arith.constant 0 : i32
    %c0_i32_0 = arith.constant 0 : i32
    %c0_i32_1 = arith.constant 0 : i32
    return %c0_i32, %c0_i32_0 : i32, i32
  }
  func.func @transform_5(%arg0: i32) -> (i32, i32) {
    %c0_i32 = arith.constant 0 : i32
    %c0_i32_0 = arith.constant 0 : i32
    %c0_i32_1 = arith.constant 0 : i32
    return %c0_i32, %c0_i32_0 : i32, i32
  }
  func.func @transform_6(%arg0: i32) -> (i32, i32) {
    %c0_i32 = arith.constant 0 : i32
    %c0_i32_0 = arith.constant 0 : i32
    %c0_i32_1 = arith.constant 0 : i32
    return %c0_i32, %c0_i32_0 : i32, i32
  }
  func.func @transform_7(%arg0: i32) -> (i32, i32) {
    %c0_i32 = arith.constant 0 : i32
    %c0_i32_0 = arith.constant 0 : i32
    %c0_i32_1 = arith.constant 0 : i32
    return %c0_i32, %c0_i32_0 : i32, i32
  }
  func.func @transform_8(%arg0: i32) -> (i32, i32) {
    %c0_i32 = arith.constant 0 : i32
    %c0_i32_0 = arith.constant 0 : i32
    %c0_i32_1 = arith.constant 0 : i32
    return %c0_i32, %c0_i32_0 : i32, i32
  }
  func.func @transform_9(%arg0: i32) -> (i32, i32) {
    %c0_i32 = arith.constant 0 : i32
    %c0_i32_0 = arith.constant 0 : i32
    %c0_i32_1 = arith.constant 0 : i32
    return %c0_i32, %c0_i32_0 : i32, i32
  }
}

</mosaic_0001>

<bundles_post_ra>
// kernel: conv_block_forward.1
= control target key start
LH: loop header
LB: loop body
LE: loop exit
PB: predicated region body
PF: predicated region fallthrough
CT: control target
= control target key end

     0   :  { %vm63_vm0 = vcmask 261120   ;;  %vm275_vm1 = vcmask 523264   ;;  %s3131_s0 = inlined_call_operand.vmem [shape: f32[32,64], index: 0, kind: input, shape index: {}]   ;;  %s3132_s3 = inlined_call_operand.vmem [shape: f32[2,32,32], index: 3, kind: input, shape index: {}]   ;;  %s3133_s1 = inlined_call_operand.vmem [shape: f32[3,64,128], index: 1, kind: input, shape index: {}]   ;;  %s3134_s4 = inlined_call_operand.vmem [shape: f32[128,128], index: 4, kind: input, shape index: {}]   ;;  %s3135_s5 = inlined_call_operand.vmem [shape: f32[1,128], index: 5, kind: input, shape index: {}]   ;;  %s3136_s6 = inlined_call_operand.vmem [shape: f32[1,128], index: 6, kind: input, shape index: {}]   ;;  %s3137_s2 = inlined_call_operand.vmem [shape: f32[3,128,128], index: 2, kind: input, shape index: {}]   ;;  %s3138_s7 = inlined_call_operand.vmem [shape: f32[1,128], index: 7, kind: input, shape index: {}]   ;;  %s3139_s8 = inlined_call_operand.vmem [shape: f32[1,128], index: 8, kind: input, shape index: {}]   ;;  %s3140_s9 = inlined_call_operand.vmem [shape: f32[32,128], index: 9, kind: output, shape index: {}]  }
   0x1   :  { %v2574_v0 = vld [vmem:[%s3131_s0] sm:$0xff]  ;;  %v2579_v1 = vld [vmem:[%s3131_s0 + $0x8] sm:$0xff]  ;;  %v2584_v2 = vld [vmem:[%s3131_s0 + $0x10] sm:$0xff] }
   0x2   :  { %v2197_v3 = vpack.c.bf16 %v2579_v1, %v2574_v0  ;;  %v2591_v4 = vld [vmem:[%s3131_s0 + $0x18] sm:$0xff]  ;;  %v2596_v5 = vld [vmem:[%s3132_s3] sm:$0xff]  ;;  %v259_v9 = vld [vmem:[%s3133_s1 + $0x8] sm:$0xff] }
   0x3   :  { %v2201_v6 = vpack.c.bf16 %v2591_v4, %v2584_v2  ;;  %1817 = vmatprep.mubr.msk.f32.mxu0 %vm63_vm0, %v2596_v5  ;;  %v2605_v7 = vld [vmem:[%s3132_s3 + $0x20] sm:$0xff]  ;;  %v260_v11 = vld [vmem:[%s3133_s1 + $0x10] sm:$0xff]  ;;  %v261_v12 = vld [vmem:[%s3133_s1 + $0x18] sm:$0xff] }
   0x4   :  { %2198 = vmatprep.subr.bf16.mxu0 %v2197_v3  ;;  %2206 = vmatprep.subr.bf16.mxu1 %v2197_v3  ;;  %v258_v8 = vld [vmem:[%s3133_s1] sm:$0xff]  ;;  %v2624_v13 = vld [vmem:[%s3132_s3 + $0x8] sm:$0xff]  ;;  %v2634_v15 = vld [vmem:[%s3132_s3 + $0x10] sm:$0xff]  ;;  %v2233_v17 = vpack.c.bf16 %v261_v12, %v260_v11 }
   0x5   :  { %2200 = vmatpush3.bf16.msra.mxu0 %v2197_v3  ;;  %2208 = vmatpush3.bf16.msra.mxu1 %v2197_v3  ;;  %v2229_v10 = vpack.c.bf16 %v259_v9, %v258_v8  ;;  %v2629_v14 = vld [vmem:[%s3132_s3 + $0x28] sm:$0xff]  ;;  %v2639_v16 = vld [vmem:[%s3132_s3 + $0x30] sm:$0xff]  ;;  %v262_v18 = vld [vmem:[%s3133_s1 + $0x20] sm:$0xff] }
   0x6   :  { %2202 = vmatprep.subr.bf16.mxu0 %v2201_v6  ;;  %2210 = vmatprep.subr.bf16.mxu1 %v2201_v6  ;;  %v263_v19 = vld [vmem:[%s3133_s1 + $0x28] sm:$0xff]  ;;  %v2656_v20 = vld [vmem:[%s3132_s3 + $0x18] sm:$0xff]  ;;  %v264_v23 = vld [vmem:[%s3133_s1 + $0x30] sm:$0xff] }
   0x7   :  { %1831 = vmatprep.mubr.msk.f32.mxu1 %vm63_vm0, %v2605_v7  ;;  %v2663_v21 = vld [vmem:[%s3132_s3 + $0x38] sm:$0xff]  ;;  %v2237_v22 = vpack.c.bf16 %v263_v19, %v262_v18  ;;  %v1531_v26 = vld [vmem:[%s3133_s1 + $0x40] sm:$0xff]  ;;  %v1532_v27 = vld [vmem:[%s3133_s1 + $0x48] sm:$0xff] }
   0x8   :  { %v265_v24 = vld [vmem:[%s3133_s1 + $0x38] sm:$0xff]  ;;  %v2213_v28 = vpack.c.bf16 %v1532_v27, %v1531_v26  ;;  %v1547_v29 = vld [vmem:[%s3133_s1 + $0x80] sm:$0xff]  ;;  %v1548_v30 = vld [vmem:[%s3133_s1 + $0x88] sm:$0xff] }
   0x9   :  { %2204 = vmatpush3.bf16.msra.mxu0 %v2201_v6  ;;  %2212 = vmatpush3.bf16.msra.mxu1 %v2201_v6  ;;  %v2241_v25 = vpack.c.bf16 %v265_v24, %v264_v23  ;;  %v2687_v31 = vpack.c.bf16 %v1548_v30, %v1547_v29  ;;  %v1533_v32 = vld [vmem:[%s3133_s1 + $0x50] sm:$0xff]  ;;  %v1534_v33 = vld [vmem:[%s3133_s1 + $0x58] sm:$0xff]  ;;  %v1535_v35 = vld [vmem:[%s3133_s1 + $0x60] sm:$0xff] }
   0xa   :  { %2230 = vmatprep.subr.bf16.mxu0 %v2229_v10  ;;  %2214 = vmatprep.subr.bf16.mxu1 %v2213_v28  ;;  %v2217_v34 = vpack.c.bf16 %v1534_v33, %v1533_v32  ;;  %v1536_v36 = vld [vmem:[%s3133_s1 + $0x68] sm:$0xff]  ;;  %v1537_v38 = vld [vmem:[%s3133_s1 + $0x70] sm:$0xff]  ;;  %v1538_v39 = vld [vmem:[%s3133_s1 + $0x78] sm:$0xff] }
   0xb   :  { %v2221_v37 = vpack.c.bf16 %v1536_v36, %v1535_v35  ;;  %v2225_v40 = vpack.c.bf16 %v1538_v39, %v1537_v38  ;;  %v41_v41 = vld [vmem:[%s3134_s4] sm:$0xff]  ;;  %v42_v42 = vld [vmem:[%s3134_s4 + $0x8] sm:$0xff]  ;;  %v43_v43 = vld [vmem:[%s3134_s4 + $0x10] sm:$0xff] }
   0xc   :  { %1818 = vmatmul.mubr.msk.f32.vlgmr.msra.gmra.mrb[0].mxu0 %vm63_vm0, %v2624_v13  ;;  %1832 = vmatmul.mubr.msk.f32.vlgmr.msra.gmra.mrb[0].mxu1 %vm63_vm0, %v2629_v14  ;;  %v2725_v44 = vpack.c.bf16 %v42_v42, %v41_v41  ;;  %v44_v45 = vld [vmem:[%s3134_s4 + $0x18] sm:$0xff]  ;;  %v45_v47 = vld [vmem:[%s3134_s4 + $0x20] sm:$0xff]  ;;  %v46_v48 = vld [vmem:[%s3134_s4 + $0x28] sm:$0xff] }
   0xd   :  { %1820 = vmatprep.mubr.msk.f32.mxu0 %vm63_vm0, %v2634_v15  ;;  %1834 = vmatprep.mubr.msk.f32.mxu1 %vm63_vm0, %v2639_v16  ;;  %v2730_v46 = vpack.c.bf16 %v44_v45, %v43_v43  ;;  %v2741_v49 = vpack.c.bf16 %v46_v48, %v45_v47  ;;  %v47_v50 = vld [vmem:[%s3134_s4 + $0x30] sm:$0xff]  ;;  %v48_v51 = vld [vmem:[%s3134_s4 + $0x38] sm:$0xff]  ;;  %v49_v53 = vld [vmem:[%s3134_s4 + $0x40] sm:$0xff] }
   0xe   :  { %2232 = vmatpush3.bf16.msra.mxu0 %v2229_v10  ;;  %2216 = vmatpush3.bf16.msra.mxu1 %v2213_v28  ;;  %v2751_v52 = vpack.c.bf16 %v48_v51, %v47_v50  ;;  %v50_v54 = vld [vmem:[%s3134_s4 + $0x48] sm:$0xff]  ;;  %v51_v56 = vld [vmem:[%s3134_s4 + $0x50] sm:$0xff]  ;;  %v52_v57 = vld [vmem:[%s3134_s4 + $0x58] sm:$0xff] }
   0xf   :  { %2234 = vmatprep.subr.bf16.mxu0 %v2233_v17  ;;  %2218 = vmatprep.subr.bf16.mxu1 %v2217_v34  ;;  %v2761_v55 = vpack.c.bf16 %v50_v54, %v49_v53  ;;  %v2771_v58 = vpack.c.bf16 %v52_v57, %v51_v56  ;;  %v53_v59 = vld [vmem:[%s3134_s4 + $0x60] sm:$0xff]  ;;  %v54_v60 = vld [vmem:[%s3134_s4 + $0x68] sm:$0xff]  ;;  %v1549_v62 = vld [vmem:[%s3133_s1 + $0x90] sm:$0xff] }
  0x10   :  { %1821 = vmatmul.mubr.msk.f32.gmra.mrb[2].mxu0 %vm63_vm0, %v2656_v20  ;;  %1835 = vmatmul.mubr.msk.f32.gmra.mrb[2].mxu1 %vm63_vm0, %v2663_v21  ;;  %v2781_v61 = vpack.c.bf16 %v54_v60, %v53_v59  ;;  %v1550_v63 = vld [vmem:[%s3133_s1 + $0x98] sm:$0xff]  ;;  %v1551_v6 = vld [vmem:[%s3133_s1 + $0xa0] sm:$0xff]  ;;  %v1552_v8 = vld [vmem:[%s3133_s1 + $0xa8] sm:$0xff] }
  0x11   :  { %1853 = vmatprep.mubr.msk.f32.mxu1 %vm275_vm1, %v2574_v0  ;;  %v2249_v3 = vpack.c.bf16 %v1550_v63, %v1549_v62  ;;  %v2253_v12 = vpack.c.bf16 %v1552_v8, %v1551_v6  ;;  %v1553_v18 = vld [vmem:[%s3133_s1 + $0xb0] sm:$0xff]  ;;  %v1554_v19 = vld [vmem:[%s3133_s1 + $0xb8] sm:$0xff] }
  0x12   :  { %2236 = vmatpush3.bf16.msra.mxu0 %v2233_v17  ;;  %2220 = vmatpush3.bf16.msra.mxu1 %v2217_v34  ;;  %v55_v23 = vld [vmem:[%s3134_s4 + $0x70] sm:$0xff]  ;;  %v56_v24 = vld [vmem:[%s3134_s4 + $0x78] sm:$0xff] }
  0x13   :  { %2238 = vmatprep.subr.bf16.mxu0 %v2237_v22  ;;  %2222 = vmatprep.subr.bf16.mxu1 %v2221_v37 }
  0x16   :  { %2240 = vmatpush3.bf16.msra.mxu0 %v2237_v22  ;;  %2224 = vmatpush3.bf16.msra.mxu1 %v2221_v37  ;;  %v2257_v22 = vpack.c.bf16 %v1554_v19, %v1553_v18 }
  0x17   :  { %2242 = vmatprep.subr.bf16.mxu0 %v2241_v25  ;;  %2226 = vmatprep.subr.bf16.mxu1 %v2225_v40 }
  0x1a   :  { %2244 = vmatpush3.bf16.msra.mxu0 %v2241_v25  ;;  %2228 = vmatpush3.bf16.msra.mxu1 %v2225_v40  ;;  %v2821_v25 = vpack.c.bf16 %v56_v24, %v55_v23  ;;  %v783_v23 = vlaneseq }
  0x1b   :  { %2246 = vmatprep.subr.bf16.mxu0 %v2687_v31  ;;  %2262 = vmatprep.subr.bf16.mxu1 %v2725_v44 }
  0x1c   :  { %v2878_v24 = vshrl.u32 %v783_v23, 7  ;;  %v981_v23 = vld [vmem:[%s3137_s2 + $0x20] sm:$0xff] }
  0x1d   :  { %1854 = vmatmul.mubr.msk.f32.vlgmr.msra.gmra.mrb[4].mxu1 %vm275_vm1, %v2579_v1 }
  0x1e   :  { %1856 = vmatprep.mubr.msk.f32.mxu1 %vm275_vm1, %v2584_v2  ;;  %2264 = vmatpush3.bf16.msra.mxu1 %v2725_v44 }
  0x1f   :  { %2266 = vmatprep.subr.bf16.mxu1 %v2730_v46 }
  0x21   :  { %1857 = vmatmul.mubr.msk.f32.gmra.mrb[6].mxu1 %vm275_vm1, %v2591_v4 }
  0x22   :  { %2268 = vmatpush3.bf16.msra.mxu1 %v2730_v46 }
  0x23   :  { %2270 = vmatprep.subr.bf16.mxu1 %v2741_v49 }
  0x26   :  { %2272 = vmatpush3.bf16.msra.mxu1 %v2741_v49 }
  0x27   :  { %2274 = vmatprep.subr.bf16.mxu1 %v2751_v52 }
  0x2a   :  { %2276 = vmatpush3.bf16.msra.mxu1 %v2751_v52 }
  0x2b   :  { %2278 = vmatprep.subr.bf16.mxu1 %v2761_v55 }
  0x2e   :  { %2280 = vmatpush3.bf16.msra.mxu1 %v2761_v55 }
  0x2f   :  { %2282 = vmatprep.subr.bf16.mxu1 %v2771_v58 }
  0x32   :  { %2284 = vmatpush3.bf16.msra.mxu1 %v2771_v58 }
  0x33   :  { %2286 = vmatprep.subr.bf16.mxu1 %v2781_v61 }
  0x36   :  { %2288 = vmatpush3.bf16.msra.mxu1 %v2781_v61 }
  0x37   :  { %2290 = vmatprep.subr.bf16.mxu1 %v2821_v25 }
  0x3a   :  { %2292 = vmatpush3.bf16.msra.mxu1 %v2821_v25 }
  0x3b   :  { %2294 = vmatprep.subr.bf16.mxu1 %v2725_v44 }
  0xdf   :  { %v1819_v0 = vpop.f32.mrb[0].mxu0  ;;  %v1833_v1 = vpop.f32.mrb[0].mxu1 }
  0xe0   :  { %v142_v2 = vpop.f32.mrb[1].mxu0  ;;  %v239_v4 = vpop.f32.mrb[1].mxu1 }
  0xe1   :  { %1875 = vmatprep.mubr.msk.f32.mxu0 %vm275_vm1, %v142_v2 }
  0xe2   :  { %1876 = vmatmul.mubr.msk.f32.vlgmr.msra.gmra.mrb[4].mxu0 %vm275_vm1, %v1819_v0 }
  0xe3   :  { %2248 = vmatpush3.bf16.msra.mxu0 %v2687_v31  ;;  %v1822_v9 = vpop.f32.mrb[2].mxu0  ;;  %v1836_v10 = vpop.f32.mrb[2].mxu1 }
  0xe4   :  { %2250 = vmatprep.subr.bf16.mxu0 %v2249_v3  ;;  %v152_v11 = vpop.f32.mrb[3].mxu0  ;;  %v249_v17 = vpop.f32.mrb[3].mxu1 }
  0xe5   :  { %1878 = vmatprep.mubr.msk.f32.mxu0 %vm275_vm1, %v152_v11 }
  0xe6   :  { %1879 = vmatmul.mubr.msk.f32.gmra.mrb[6].mxu0 %vm275_vm1, %v1822_v9 }
  0xe7   :  { %2252 = vmatpush3.bf16.msra.mxu0 %v2249_v3  ;;  %1897 = vmatprep.mubr.msk.f32.mxu0 %vm275_vm1, %v239_v4 }
  0xe8   :  { %2254 = vmatprep.subr.bf16.mxu0 %v2253_v12 }
  0xeb   :  { %2256 = vmatpush3.bf16.msra.mxu0 %v2253_v12 }
  0xec   :  { %2258 = vmatprep.subr.bf16.mxu0 %v2257_v22 }
  0xef   :  { %2260 = vmatpush3.bf16.msra.mxu0 %v2257_v22 }
  0xf0   :  { %v1855_v26 = vpop.f32.mrb[4].mxu1 }
  0xf1   :  { %v354_v27 = vpop.f32.mrb[5].mxu1 }
  0xf2   :  { %1898 = vmatmul.mubr.msk.f32.vlgmr.msra.gmra.mrb[4].mxu0 %vm275_vm1, %v1833_v1 }
  0xf3   :  { %1900 = vmatprep.mubr.msk.f32.mxu0 %vm275_vm1, %v249_v17 }
  0xf4   :  { %v1858_v28 = vpop.f32.mrb[6].mxu1 }
  0xf6   :  { %1901 = vmatmul.mubr.msk.f32.gmra.mrb[6].mxu0 %vm275_vm1, %v1836_v10 }
  0xf7   :  { %1987 = vmatprep.mubr.msk.f32.mxu0 %vm63_vm0, %v2596_v5  ;;  %v364_v5 = vpop.f32.mrb[7].mxu1 }
 0x1c5   :  { %v1899_v29 = vpop.f32.mrb[4].mxu0 }
 0x1c6   :  { %v2826_v30 = vadd.f32 %v1899_v29, %v1855_v26  ;;  %v557_v31 = vpop.f32.mrb[5].mxu0  ;;  %v61_v26 = vld [vmem:[%s3135_s5] sm:$0x1] }
 0x1c7   :  { %v2828_v32 = vadd.f32 %v557_v31, %v354_v27  ;;  %v785_v27 = vsub.s32 0, %v2878_v24 }
 0x1c8   :  { %v666_v38 = vmul.f32 %v2826_v30, %v2826_v30 }
 0x1c9   :  { %v1902_v33 = vpop.f32.mrb[6].mxu0  ;;  %1935 = vmatprep.mubr.f32.mxu1 %v2828_v32  ;;  %v665_v37 = vmul.f32 %v2828_v32, %v2828_v32 }
 0x1ca   :  { %v2831_v34 = vadd.f32 %v1902_v33, %v1858_v28  ;;  %v567_v35 = vpop.f32.mrb[7].mxu0  ;;  %1936 = vmatmul.mubr.f32.vlgmr.msra.gmra.mrb[8].mxu1 %v2826_v30 }
 0x1cb   :  { %v2834_v36 = vadd.f32 %v567_v35, %v364_v5  ;;  %2296 = vmatpush3.bf16.msra.mxu1 %v2725_v44 }
 0x1cc   :  { %2298 = vmatprep.subr.bf16.mxu1 %v2730_v46  ;;  %v668_v40 = vmul.f32 %v2831_v34, %v2831_v34 }
 0x1cd   :  { %1938 = vmatprep.mubr.f32.mxu1 %v2834_v36  ;;  %v667_v39 = vmul.f32 %v2834_v36, %v2834_v36 }
 0x1ce   :  { %1939 = vmatmul.mubr.f32.gmra.mrb[10].mxu1 %v2831_v34 }
 0x1cf   :  { %2300 = vmatpush3.bf16.msra.mxu1 %v2730_v46  ;;  %1973 = vmatprep.mubr.f32.mxu1 %v665_v37 }
 0x1d0   :  { %2302 = vmatprep.subr.bf16.mxu1 %v2741_v49 }
 0x1d3   :  { %2304 = vmatpush3.bf16.msra.mxu1 %v2741_v49 }
 0x1d4   :  { %2306 = vmatprep.subr.bf16.mxu1 %v2751_v52 }
 0x1d7   :  { %2308 = vmatpush3.bf16.msra.mxu1 %v2751_v52 }
 0x1d8   :  { %2310 = vmatprep.subr.bf16.mxu1 %v2761_v55 }
 0x1db   :  { %2312 = vmatpush3.bf16.msra.mxu1 %v2761_v55 }
 0x1dc   :  { %2314 = vmatprep.subr.bf16.mxu1 %v2771_v58 }
 0x1df   :  { %2316 = vmatpush3.bf16.msra.mxu1 %v2771_v58 }
 0x1e0   :  { %2318 = vmatprep.subr.bf16.mxu1 %v2781_v61 }
 0x1e3   :  { %2320 = vmatpush3.bf16.msra.mxu1 %v2781_v61 }
 0x1e4   :  { %2322 = vmatprep.subr.bf16.mxu1 %v2821_v25 }
 0x1e7   :  { %2324 = vmatpush3.bf16.msra.mxu1 %v2821_v25 }
 0x1e8   :  { %2438 = vmatprep.subr.bf16.mxu1 %v2725_v44 }
 0x1ea   :  { %1974 = vmatmul.mubr.f32.vlgmr.msra.gmra.mrb[12].mxu1 %v666_v38  ;;  %v1559_v38 = vld [vmem:[%s3136_s6] ss:$0 sm:$0xff] }
 0x1eb   :  { %1976 = vmatprep.mubr.f32.mxu1 %v667_v39  ;;  %2440 = vmatpush3.bf16.msra.mxu1 %v2725_v44 }
 0x1ec   :  { %2442 = vmatprep.subr.bf16.mxu1 %v2730_v46 }
 0x1ee   :  { %1977 = vmatmul.mubr.f32.gmra.mrb[14].mxu1 %v668_v40 }
 0x1ef   :  { %2444 = vmatpush3.bf16.msra.mxu1 %v2730_v46 }
 0x1f0   :  { %2446 = vmatprep.subr.bf16.mxu1 %v2741_v49 }
 0x1f3   :  { %2448 = vmatpush3.bf16.msra.mxu1 %v2741_v49 }
 0x1f4   :  { %2450 = vmatprep.subr.bf16.mxu1 %v2751_v52 }
 0x1f7   :  { %2452 = vmatpush3.bf16.msra.mxu1 %v2751_v52 }
 0x1f8   :  { %2454 = vmatprep.subr.bf16.mxu1 %v2761_v55 }
 0x1fb   :  { %2456 = vmatpush3.bf16.msra.mxu1 %v2761_v55 }
 0x1fc   :  { %2458 = vmatprep.subr.bf16.mxu1 %v2771_v58 }
 0x1ff   :  { %2460 = vmatpush3.bf16.msra.mxu1 %v2771_v58 }
 0x200   :  { %2462 = vmatprep.subr.bf16.mxu1 %v2781_v61 }
 0x203   :  { %2464 = vmatpush3.bf16.msra.mxu1 %v2781_v61 }
 0x204   :  { %2466 = vmatprep.subr.bf16.mxu1 %v2821_v25 }
 0x207   :  { %2468 = vmatpush3.bf16.msra.mxu1 %v2821_v25 }
 0x208   :  { %2470 = vmatprep.subr.bf16.mxu1 %v2725_v44 }
 0x29d   :  { %v1937_v41 = vpop.f32.mrb[8].mxu1 }
 0x29e   :  { %v646_v42 = vpop.f32.mrb[9].mxu1 }
 0x29f   :  { %v754_v43 = vadd.f32 %v1937_v41, %v646_v42 }
 0x2a1   :  { %v1940_v45 = vpop.f32.mrb[10].mxu1 }
 0x2a2   :  { %v656_v47 = vpop.f32.mrb[11].mxu1 }
 0x2a3   :  { %v755_v48 = vadd.f32 %v754_v43, %v656_v47 }
 0x2a5   :  { %v756_v50 = vadd.f32 %v1940_v45, %v755_v48 }
 0x2a7   :  { %v757_v51 = vrot.slane %v756_v50, 4 }
 0x2a9   :  { %v758_v53 = vadd.f32 %v757_v51, %v756_v50 }
 0x2ab   :  { %v759_v57 = vrot.slane %v758_v53, 2 }
 0x2ad   :  { %v760_v63 = vadd.f32 %v759_v57, %v758_v53  ;;  %v1568_v53 = vld [vmem:[%s3137_s2 + $0x80] sm:$0xff]  ;;  %v1570_v57 = vld [vmem:[%s3137_s2 + $0x90] sm:$0xff] }
 0x2af   :  { %v761_v2 = vrot.slane %v760_v63, 1 }
 0x2b1   :  { %v762_v6 = vadd.f32 %v761_v2, %v760_v63  ;;  %v1577_v63 = vld [vmem:[%s3137_s2 + $0xc8] sm:$0xff] }
 0x2b3   :  { %v763_v10 = vmul.f32 0.001953125, %v762_v6 }
 0x2b5   :  { %v774_v18 = vmul.f32 %v763_v10, %v763_v10  ;;  %v778_v29 = vsub.f32 %v2828_v32, %v763_v10  ;;  %v779_v31 = vsub.f32 %v2826_v30, %v763_v10  ;;  %v780_v35 = vsub.f32 %v2834_v36, %v763_v10 }
 0x2b6   :  { %v781_v37 = vsub.f32 %v2831_v34, %v763_v10 }
 0x2bd   :  { %v1975_v54 = vpop.f32.mrb[12].mxu1 }
 0x2be   :  { %v735_v56 = vpop.f32.mrb[13].mxu1 }
 0x2bf   :  { %v764_v59 = vadd.f32 %v1975_v54, %v735_v56  ;;  %v1569_v54 = vld [vmem:[%s3137_s2 + $0x88] sm:$0xff] }
 0x2c0   :  { %v2341_v56 = vpack.c.bf16 %v1569_v54, %v1568_v53 }
 0x2c1   :  { %v1978_v60 = vpop.f32.mrb[14].mxu1 }
 0x2c2   :  { %v745_v62 = vpop.f32.mrb[15].mxu1 }
 0x2c3   :  { %v765_v0 = vadd.f32 %v764_v59, %v745_v62  ;;  %v1571_v59 = vld [vmem:[%s3137_s2 + $0x98] sm:$0xff] }
 0x2c4   :  { %v1575_v62 = vld [vmem:[%s3137_s2 + $0xb8] sm:$0xff] }
 0x2c5   :  { %v766_v1 = vadd.f32 %v1978_v60, %v765_v0  ;;  %v1573_v60 = vld [vmem:[%s3137_s2 + $0xa8] sm:$0xff] }
 0x2c7   :  { %v767_v3 = vrot.slane %v766_v1, 4 }
 0x2c9   :  { %v768_v4 = vadd.f32 %v767_v3, %v766_v1  ;;  %v1578_v1 = vld [vmem:[%s3137_s2 + $0xd0] sm:$0xff]  ;;  %v1580_v3 = vld [vmem:[%s3137_s2 + $0xe0] sm:$0xff] }
 0x2cb   :  { %v769_v8 = vrot.slane %v768_v4, 2 }
 0x2cd   :  { %v770_v9 = vadd.f32 %v769_v8, %v768_v4  ;;  %v1581_v4 = vld [vmem:[%s3137_s2 + $0xe8] sm:$0xff]  ;;  %v1582_v8 = vld [vmem:[%s3137_s2 + $0xf0] sm:$0xff] }
 0x2ce   :  { %v2365_v6 = vpack.c.bf16 %v1581_v4, %v1580_v3  ;;  %v1595_v3 = vld [vmem:[%s3137_s2 + $0x158] sm:$0xff] }
 0x2cf   :  { %v771_v11 = vrot.slane %v770_v9, 1 }
 0x2d1   :  { %v772_v12 = vadd.f32 %v771_v11, %v770_v9  ;;  %v1583_v9 = vld [vmem:[%s3137_s2 + $0xf8] sm:$0xff]  ;;  %v977_v11 = vld [vmem:[%s3137_s2] sm:$0xff] }
 0x2d2   :  { %v2369_v10 = vpack.c.bf16 %v1583_v9, %v1582_v8  ;;  %v1597_v8 = vld [vmem:[%s3137_s2 + $0x168] sm:$0xff] }
 0x2d3   :  { %v773_v17 = vmul.f32 0.001953125, %v772_v12  ;;  %v978_v12 = vld [vmem:[%s3137_s2 + $0x8] sm:$0xff] }
 0x2d5   :  { %v775_v19 = vsub.f32 %v773_v17, %v774_v18  ;;  %v2373_v17 = vpack.c.bf16 %v978_v12, %v977_v11  ;;  %v979_v18 = vld [vmem:[%s3137_s2 + $0x10] sm:$0xff]  ;;  %v1599_v11 = vld [vmem:[%s3137_s2 + $0x178] sm:$0xff] }
 0x2d7   :  { %v776_v22 = vadd.f32 1e-05, %v775_v19  ;;  %v980_v19 = vld [vmem:[%s3137_s2 + $0x18] sm:$0xff] }
 0x2d9   :  { %2517 = vrsqrt.f32 %v776_v22  ;;  %v2377_v22 = vpack.c.bf16 %v980_v19, %v979_v18 }
 0x2e3   :  { %v2518_v28 = vpop.eup %2517 }
 0x2e4   :  { %v782_v5 = vmul.f32 %v2518_v28, %v61_v26  ;;  %v982_v26 = vld [vmem:[%s3137_s2 + $0x28] sm:$0xff] }
 0x2e5   :  { %v2381_v28 = vpack.c.bf16 %v982_v26, %v981_v23 }
 0x2e6   :  { %v786_v33 = vrot.slane %v782_v5, %v785_v27  ;;  %v983_v5 = vld [vmem:[%s3137_s2 + $0x30] sm:$0xff] }
 0x2e8   :  { %v787_v39 = vmul.f32 %v786_v33, %v778_v29  ;;  %v788_v40 = vmul.f32 %v786_v33, %v779_v31  ;;  %v789_v41 = vmul.f32 %v786_v33, %v780_v35  ;;  %v790_v42 = vmul.f32 %v786_v33, %v781_v37  ;;  %v984_v29 = vld [vmem:[%s3137_s2 + $0x38] sm:$0xff]  ;;  %v985_v33 = vld [vmem:[%s3137_s2 + $0x40] sm:$0xff]  ;;  %v986_v35 = vld [vmem:[%s3137_s2 + $0x48] sm:$0xff] }
 0x2e9   :  { %v2385_v31 = vpack.c.bf16 %v984_v29, %v983_v5  ;;  %v2389_v37 = vpack.c.bf16 %v986_v35, %v985_v33 }
 0x2ea   :  { %v797_v43 = vadd.f32 %v1559_v38, %v787_v39  ;;  %v2893_v45 = vadd.f32 %v1559_v38, %v788_v40  ;;  %v2895_v32 = vadd.f32 %v1559_v38, %v789_v41  ;;  %v2897_v30 = vadd.f32 %v1559_v38, %v790_v42  ;;  %v987_v38 = vld [vmem:[%s3137_s2 + $0x50] sm:$0xff]  ;;  %v988_v39 = vld [vmem:[%s3137_s2 + $0x58] sm:$0xff]  ;;  %v989_v41 = vld [vmem:[%s3137_s2 + $0x60] sm:$0xff] }
 0x2eb   :  { %v2393_v40 = vpack.c.bf16 %v988_v39, %v987_v38  ;;  %v990_v42 = vld [vmem:[%s3137_s2 + $0x68] sm:$0xff] }
 0x2ec   :  { %v801_v47 = vmax.f32 %v797_v43, 0.0  ;;  %v802_v36 = vmax.f32 %v2893_v45, 0.0  ;;  %v803_v34 = vmax.f32 %v2895_v32, 0.0  ;;  %v804_v48 = vmax.f32 %v2897_v30, 0.0  ;;  %v991_v45 = vld [vmem:[%s3137_s2 + $0x70] sm:$0xff]  ;;  %v992_v32 = vld [vmem:[%s3137_s2 + $0x78] sm:$0xff] }
 0x2ed   :  { %v2397_v43 = vpack.c.bf16 %v990_v42, %v989_v41  ;;  %v2401_v30 = vpack.c.bf16 %v992_v32, %v991_v45 }
 0x2ee   :  { %v2325_v50 = vpack.c.bf16 %v802_v36, %v801_v47  ;;  %v2329_v51 = vpack.c.bf16 %v804_v48, %v803_v34 }
 0x2f0   :  { %2326 = vmatprep.subr.bf16.mxu0 %v2325_v50 }
 0x2f1   :  { %2328 = vmatpush3.bf16.msra.mxu0 %v2325_v50 }
 0x2f2   :  { %2330 = vmatprep.subr.bf16.mxu0 %v2329_v51 }
 0x2f5   :  { %2332 = vmatpush3.bf16.msra.mxu0 %v2329_v51 }
 0x2f6   :  { %2334 = vmatprep.subr.bf16.mxu0 %v2325_v50 }
 0x2f8   :  { %1988 = vmatmul.mubr.msk.f32.vlgmr.msra.gmra.mrb[8].mxu0 %vm63_vm0, %v2624_v13  ;;  %v2345_v13 = vpack.c.bf16 %v1571_v59, %v1570_v57  ;;  %v1589_v57 = vld [vmem:[%s3137_s2 + $0x128] sm:$0xff] }
 0x2f9   :  { %2336 = vmatpush3.bf16.msra.mxu0 %v2325_v50  ;;  %1990 = vmatprep.mubr.msk.f32.mxu0 %vm63_vm0, %v2634_v15  ;;  %v1572_v15 = vld [vmem:[%s3137_s2 + $0xa0] sm:$0xff]  ;;  %v1587_v50 = vld [vmem:[%s3137_s2 + $0x118] sm:$0xff] }
 0x2fa   :  { %2338 = vmatprep.subr.bf16.mxu0 %v2329_v51 }
 0x2fc   :  { %1991 = vmatmul.mubr.msk.f32.gmra.mrb[10].mxu0 %vm63_vm0, %v2656_v20  ;;  %v2349_v20 = vpack.c.bf16 %v1573_v60, %v1572_v15  ;;  %v1590_v60 = vld [vmem:[%s3137_s2 + $0x130] sm:$0xff] }
 0x2fd   :  { %2340 = vmatpush3.bf16.msra.mxu0 %v2329_v51  ;;  %2001 = vmatprep.mubr.msk.f32.mxu0 %vm63_vm0, %v2605_v7  ;;  %v1574_v7 = vld [vmem:[%s3137_s2 + $0xb0] sm:$0xff] }
 0x2fe   :  { %2342 = vmatprep.subr.bf16.mxu0 %v2341_v56 }
 0x300   :  { %2002 = vmatmul.mubr.msk.f32.vlgmr.msra.gmra.mrb[12].mxu0 %vm63_vm0, %v2629_v14  ;;  %v2353_v14 = vpack.c.bf16 %v1575_v62, %v1574_v7 }
 0x301   :  { %2344 = vmatpush3.bf16.msra.mxu0 %v2341_v56  ;;  %2004 = vmatprep.mubr.msk.f32.mxu0 %vm63_vm0, %v2639_v16  ;;  %v1576_v16 = vld [vmem:[%s3137_s2 + $0xc0] sm:$0xff] }
 0x302   :  { %2346 = vmatprep.subr.bf16.mxu0 %v2345_v13  ;;  %v2357_v0 = vpack.c.bf16 %v1577_v63, %v1576_v16  ;;  %v1588_v56 = vld [vmem:[%s3137_s2 + $0x120] sm:$0xff]  ;;  %v1593_v63 = vld [vmem:[%s3137_s2 + $0x148] sm:$0xff] }
 0x303   :  { %v1592_v16 = vld [vmem:[%s3137_s2 + $0x140] sm:$0xff] }
 0x304   :  { %2005 = vmatmul.mubr.msk.f32.gmra.mrb[14].mxu0 %vm63_vm0, %v2663_v21  ;;  %v1579_v21 = vld [vmem:[%s3137_s2 + $0xd8] sm:$0xff] }
 0x305   :  { %2348 = vmatpush3.bf16.msra.mxu0 %v2345_v13  ;;  %2039 = vmatprep.mubr.f32.mxu0 %v801_v47  ;;  %v2361_v2 = vpack.c.bf16 %v1579_v21, %v1578_v1  ;;  %v1584_v47 = vld [vmem:[%s3137_s2 + $0x100] sm:$0xff]  ;;  %v2413_v13 = vpack.c.bf16 %v1589_v57, %v1588_v56  ;;  %v2421_v1 = vpack.c.bf16 %v1593_v63, %v1592_v16 }
 0x306   :  { %2350 = vmatprep.subr.bf16.mxu0 %v2349_v20 }
 0x309   :  { %2352 = vmatpush3.bf16.msra.mxu0 %v2349_v20  ;;  %v1591_v20 = vld [vmem:[%s3137_s2 + $0x138] sm:$0xff] }
 0x30a   :  { %2354 = vmatprep.subr.bf16.mxu0 %v2353_v14  ;;  %v2417_v62 = vpack.c.bf16 %v1591_v20, %v1590_v60  ;;  %v805_v60 = vld [vmem:[%s3138_s7] sm:$0x1] }
 0x30d   :  { %2356 = vmatpush3.bf16.msra.mxu0 %v2353_v14 }
 0x30e   :  { %2358 = vmatprep.subr.bf16.mxu0 %v2357_v0 }
 0x311   :  { %2360 = vmatpush3.bf16.msra.mxu0 %v2357_v0 }
 0x312   :  { %2362 = vmatprep.subr.bf16.mxu0 %v2361_v2 }
 0x315   :  { %2364 = vmatpush3.bf16.msra.mxu0 %v2361_v2  ;;  %v1594_v2 = vld [vmem:[%s3137_s2 + $0x150] sm:$0xff] }
 0x316   :  { %2366 = vmatprep.subr.bf16.mxu0 %v2365_v6  ;;  %v2425_v4 = vpack.c.bf16 %v1595_v3, %v1594_v2 }
 0x319   :  { %2368 = vmatpush3.bf16.msra.mxu0 %v2365_v6  ;;  %v1596_v6 = vld [vmem:[%s3137_s2 + $0x160] sm:$0xff] }
 0x31a   :  { %2370 = vmatprep.subr.bf16.mxu0 %v2369_v10  ;;  %v2429_v9 = vpack.c.bf16 %v1597_v8, %v1596_v6 }
 0x31d   :  { %2372 = vmatpush3.bf16.msra.mxu0 %v2369_v10  ;;  %v1598_v10 = vld [vmem:[%s3137_s2 + $0x170] sm:$0xff] }
 0x31e   :  { %2374 = vmatprep.subr.bf16.mxu0 %v2373_v17  ;;  %v2433_v12 = vpack.c.bf16 %v1599_v11, %v1598_v10 }
 0x320   :  { %2040 = vmatmul.mubr.f32.vlgmr.msra.gmra.mrb[16].mxu0 %v802_v36  ;;  %v1585_v36 = vld [vmem:[%s3137_s2 + $0x108] sm:$0xff] }
 0x321   :  { %2042 = vmatprep.mubr.f32.mxu0 %v803_v34  ;;  %2376 = vmatpush3.bf16.msra.mxu0 %v2373_v17  ;;  %v2405_v34 = vpack.c.bf16 %v1585_v36, %v1584_v47 }
 0x322   :  { %2378 = vmatprep.subr.bf16.mxu0 %v2377_v22 }
 0x324   :  { %2043 = vmatmul.mubr.f32.gmra.mrb[18].mxu0 %v804_v48  ;;  %v1586_v48 = vld [vmem:[%s3137_s2 + $0x110] sm:$0xff] }
 0x325   :  { %2380 = vmatpush3.bf16.msra.mxu0 %v2377_v22  ;;  %v2409_v54 = vpack.c.bf16 %v1587_v50, %v1586_v48 }
 0x326   :  { %2382 = vmatprep.subr.bf16.mxu0 %v2381_v28 }
 0x329   :  { %2384 = vmatpush3.bf16.msra.mxu0 %v2381_v28 }
 0x32a   :  { %2386 = vmatprep.subr.bf16.mxu0 %v2385_v31 }
 0x32d   :  { %2388 = vmatpush3.bf16.msra.mxu0 %v2385_v31 }
 0x32e   :  { %2390 = vmatprep.subr.bf16.mxu0 %v2389_v37 }
 0x331   :  { %2392 = vmatpush3.bf16.msra.mxu0 %v2389_v37 }
 0x332   :  { %2394 = vmatprep.subr.bf16.mxu0 %v2393_v40 }
 0x335   :  { %2396 = vmatpush3.bf16.msra.mxu0 %v2393_v40 }
 0x336   :  { %2398 = vmatprep.subr.bf16.mxu0 %v2397_v43 }
 0x339   :  { %2400 = vmatpush3.bf16.msra.mxu0 %v2397_v43 }
 0x33a   :  { %2402 = vmatprep.subr.bf16.mxu0 %v2401_v30 }
 0x33d   :  { %2404 = vmatpush3.bf16.msra.mxu0 %v2401_v30 }
 0x33e   :  { %2406 = vmatprep.subr.bf16.mxu0 %v2405_v34 }
 0x3cb   :  { %v1989_v51 = vpop.f32.mrb[8].mxu0 }
 0x3cc   :  { %v873_v53 = vpop.f32.mrb[9].mxu0 }
 0x3cd   :  { %2077 = vmatprep.mubr.f32.mxu0 %v873_v53 }
 0x3ce   :  { %2078 = vmatmul.mubr.f32.vlgmr.msra.gmra.mrb[16].mxu0 %v1989_v51 }
 0x3cf   :  { %2408 = vmatpush3.bf16.msra.mxu0 %v2405_v34  ;;  %v1992_v59 = vpop.f32.mrb[10].mxu0 }
 0x3d0   :  { %2410 = vmatprep.subr.bf16.mxu0 %v2409_v54  ;;  %v883_v15 = vpop.f32.mrb[11].mxu0 }
 0x3d1   :  { %2080 = vmatprep.mubr.f32.mxu0 %v883_v15 }
 0x3d2   :  { %2081 = vmatmul.mubr.f32.gmra.mrb[18].mxu0 %v1992_v59 }
 0x3d3   :  { %2412 = vmatpush3.bf16.msra.mxu0 %v2409_v54  ;;  %v2003_v7 = vpop.f32.mrb[12].mxu0 }
 0x3d4   :  { %2414 = vmatprep.subr.bf16.mxu0 %v2413_v13  ;;  %v958_v14 = vpop.f32.mrb[13].mxu0 }
 0x3d5   :  { %2115 = vmatprep.mubr.f32.mxu0 %v958_v14  ;;  %v1600_v14 = vld [vmem:[%s3139_s8] ss:$0 sm:$0xff] }
 0x3d7   :  { %2416 = vmatpush3.bf16.msra.mxu0 %v2413_v13  ;;  %v2006_v0 = vpop.f32.mrb[14].mxu0 }
 0x3d8   :  { %2418 = vmatprep.subr.bf16.mxu0 %v2417_v62  ;;  %v968_v21 = vpop.f32.mrb[15].mxu0 }
 0x3db   :  { %2420 = vmatpush3.bf16.msra.mxu0 %v2417_v62 }
 0x3dc   :  { %2422 = vmatprep.subr.bf16.mxu0 %v2421_v1 }
 0x3df   :  { %2424 = vmatpush3.bf16.msra.mxu0 %v2421_v1 }
 0x3e0   :  { %2426 = vmatprep.subr.bf16.mxu0 %v2425_v4 }
 0x3e3   :  { %2428 = vmatpush3.bf16.msra.mxu0 %v2425_v4 }
 0x3e4   :  { %2430 = vmatprep.subr.bf16.mxu0 %v2429_v9 }
 0x3e7   :  { %2432 = vmatpush3.bf16.msra.mxu0 %v2429_v9 }
 0x3e8   :  { %2434 = vmatprep.subr.bf16.mxu0 %v2433_v12 }
 0x3eb   :  { %2436 = vmatpush3.bf16.msra.mxu0 %v2433_v12 }
 0x3ee   :  { %2116 = vmatmul.mubr.f32.vlgmr.msra.gmra.mrb[16].mxu0 %v2003_v7 }
 0x3ef   :  { %2118 = vmatprep.mubr.f32.mxu0 %v968_v21 }
 0x3f2   :  { %2119 = vmatmul.mubr.f32.gmra.mrb[18].mxu0 %v2006_v0 }
 0x4c1   :  { %v3072_v17 = vpop.f32.mrb[16].mxu0 }
 0x4c2   :  { %v3074_v18 = vpop.f32.mrb[17].mxu0 }
 0x4c3   :  { %2153 = vmatprep.mubr.f32.mxu1 %v3074_v18  ;;  %v1371_v23 = vmul.f32 %v3074_v18, %v3074_v18 }
 0x4c4   :  { %2154 = vmatmul.mubr.f32.vlgmr.msra.gmra.mrb[16].mxu1 %v3072_v17 }
 0x4c5   :  { %2472 = vmatpush3.bf16.msra.mxu1 %v2725_v44  ;;  %v3079_v19 = vpop.f32.mrb[18].mxu0  ;;  %v1372_v44 = vmul.f32 %v3072_v17, %v3072_v17 }
 0x4c6   :  { %v3081_v22 = vpop.f32.mrb[19].mxu0  ;;  %2474 = vmatprep.subr.bf16.mxu1 %v2730_v46 }
 0x4c7   :  { %2156 = vmatprep.mubr.f32.mxu1 %v3081_v22 }
 0x4c8   :  { %2157 = vmatmul.mubr.f32.gmra.mrb[18].mxu1 %v3079_v19 }
 0x4c9   :  { %2476 = vmatpush3.bf16.msra.mxu1 %v2730_v46  ;;  %2191 = vmatprep.mubr.f32.mxu1 %v1371_v23  ;;  %v1373_v46 = vmul.f32 %v3081_v22, %v3081_v22 }
 0x4ca   :  { %2478 = vmatprep.subr.bf16.mxu1 %v2741_v49 }
 0x4cd   :  { %2480 = vmatpush3.bf16.msra.mxu1 %v2741_v49  ;;  %v1374_v49 = vmul.f32 %v3079_v19, %v3079_v19 }
 0x4ce   :  { %2482 = vmatprep.subr.bf16.mxu1 %v2751_v52 }
 0x4d1   :  { %2484 = vmatpush3.bf16.msra.mxu1 %v2751_v52 }
 0x4d2   :  { %2486 = vmatprep.subr.bf16.mxu1 %v2761_v55 }
 0x4d5   :  { %2488 = vmatpush3.bf16.msra.mxu1 %v2761_v55 }
 0x4d6   :  { %2490 = vmatprep.subr.bf16.mxu1 %v2771_v58 }
 0x4d9   :  { %2492 = vmatpush3.bf16.msra.mxu1 %v2771_v58 }
 0x4da   :  { %2494 = vmatprep.subr.bf16.mxu1 %v2781_v61 }
 0x4dd   :  { %2496 = vmatpush3.bf16.msra.mxu1 %v2781_v61 }
 0x4de   :  { %2498 = vmatprep.subr.bf16.mxu1 %v2821_v25 }
 0x4e1   :  { %2500 = vmatpush3.bf16.msra.mxu1 %v2821_v25 }
 0x4e4   :  { %2192 = vmatmul.mubr.f32.vlgmr.msra.gmra.mrb[20].mxu1 %v1372_v44 }
 0x4e5   :  { %2194 = vmatprep.mubr.f32.mxu1 %v1373_v46 }
 0x4e8   :  { %2195 = vmatmul.mubr.f32.gmra.mrb[22].mxu1 %v1374_v49 }
 0x597   :  { %v2155_v52 = vpop.f32.mrb[16].mxu1 }
 0x598   :  { %v1352_v55 = vpop.f32.mrb[17].mxu1 }
 0x599   :  { %v1460_v58 = vadd.f32 %v2155_v52, %v1352_v55 }
 0x59b   :  { %v2158_v61 = vpop.f32.mrb[18].mxu1 }
 0x59c   :  { %v1362_v26 = vpop.f32.mrb[19].mxu1 }
 0x59d   :  { %v1461_v28 = vadd.f32 %v1460_v58, %v1362_v26 }
 0x59f   :  { %v1462_v5 = vadd.f32 %v2158_v61, %v1461_v28 }
 0x5a1   :  { %v1463_v25 = vrot.slane %v1462_v5, 4 }
 0x5a3   :  { %v1464_v29 = vadd.f32 %v1463_v25, %v1462_v5 }
 0x5a5   :  { %v1465_v31 = vrot.slane %v1464_v29, 2 }
 0x5a7   :  { %v1466_v33 = vadd.f32 %v1465_v31, %v1464_v29 }
 0x5a9   :  { %v1467_v35 = vrot.slane %v1466_v33, 1 }
 0x5ab   :  { %v1468_v37 = vadd.f32 %v1467_v35, %v1466_v33 }
 0x5ad   :  { %v1469_v38 = vmul.f32 0.001953125, %v1468_v37 }
 0x5af   :  { %v1484_v39 = vsub.f32 %v3074_v18, %v1469_v38  ;;  %v1485_v40 = vsub.f32 %v3072_v17, %v1469_v38  ;;  %v1486_v41 = vsub.f32 %v3081_v22, %v1469_v38  ;;  %v1487_v42 = vsub.f32 %v3079_v19, %v1469_v38 }
 0x5b0   :  { %v1480_v59 = vmul.f32 %v1469_v38, %v1469_v38 }
 0x5b7   :  { %v2193_v43 = vpop.f32.mrb[20].mxu1 }
 0x5b8   :  { %v1441_v45 = vpop.f32.mrb[21].mxu1 }
 0x5b9   :  { %v1470_v32 = vadd.f32 %v2193_v43, %v1441_v45 }
 0x5bb   :  { %v2196_v30 = vpop.f32.mrb[22].mxu1 }
 0x5bc   :  { %v1451_v47 = vpop.f32.mrb[23].mxu1 }
 0x5bd   :  { %v1471_v36 = vadd.f32 %v1470_v32, %v1451_v47 }
 0x5bf   :  { %v1472_v34 = vadd.f32 %v2196_v30, %v1471_v36 }
 0x5c1   :  { %v1473_v48 = vrot.slane %v1472_v34, 4 }
 0x5c3   :  { %v1474_v50 = vadd.f32 %v1473_v48, %v1472_v34 }
 0x5c5   :  { %v1475_v51 = vrot.slane %v1474_v50, 2 }
 0x5c7   :  { %v1476_v53 = vadd.f32 %v1475_v51, %v1474_v50 }
 0x5c9   :  { %v1477_v54 = vrot.slane %v1476_v53, 1 }
 0x5cb   :  { %v1478_v56 = vadd.f32 %v1477_v54, %v1476_v53 }
 0x5cd   :  { %v1479_v57 = vmul.f32 0.001953125, %v1478_v56 }
 0x5cf   :  { %v1481_v13 = vsub.f32 %v1479_v57, %v1480_v59 }
 0x5d1   :  { %v1482_v15 = vadd.f32 1e-05, %v1481_v13 }
 0x5d3   :  { %2519 = vrsqrt.f32 %v1482_v15 }
 0x5dd   :  { %v2520_v20 = vpop.eup %2519 }
 0x5de   :  { %v1488_v7 = vmul.f32 %v2520_v20, %v805_v60 }
 0x5e0   :  { %v1492_v62 = vrot.slane %v1488_v7, %v785_v27 }
 0x5e2   :  { %v1493_v16 = vmul.f32 %v1492_v62, %v1484_v39  ;;  %v1494_v63 = vmul.f32 %v1492_v62, %v1485_v40  ;;  %v1495_v0 = vmul.f32 %v1492_v62, %v1486_v41  ;;  %v1496_v1 = vmul.f32 %v1492_v62, %v1487_v42 }
 0x5e4   :  { %v1503_v21 = vadd.f32 %v1600_v14, %v1493_v16  ;;  %v1504_v2 = vadd.f32 %v1600_v14, %v1494_v63  ;;  %v1505_v3 = vadd.f32 %v1600_v14, %v1495_v0  ;;  %v1506_v4 = vadd.f32 %v1600_v14, %v1496_v1 }
 0x5e6   :  { %v1507_v6 = vmax.f32 %v1503_v21, 0.0  ;;  %v1508_v8 = vmax.f32 %v1504_v2, 0.0  ;;  %v1509_v9 = vmax.f32 %v1505_v3, 0.0  ;;  %v1510_v10 = vmax.f32 %v1506_v4, 0.0 }
 0x5e8   :  { %1511 = vst [vmem:[%s3140_s9] sm:$0xff] %v1507_v6  ;;  %1512 = vst [vmem:[%s3140_s9 + $0x8] sm:$0xff] %v1508_v8 }
 0x5e9   :  { %1513 = vst [vmem:[%s3140_s9 + $0x10] sm:$0xff] %v1509_v9  ;;  %1514 = vst [vmem:[%s3140_s9 + $0x18] sm:$0xff] %v1510_v10 }

</bundles_post_ra>
